<compile_context>
chip_gen: v7x
topology: tpu7x:2x2x1
jax: 0.10.0
libtpu: 0.0.40
codegen_flags: <defaults>
</compile_context>

<pallas_src>
import functools

import jax
import jax.numpy as jnp
from jax.experimental import pallas as pl
from jax.experimental.pallas import tpu as pltpu

_LANE = 128            # vreg lane width
_SUBLANE_U8 = 32       # uint8 sublane tiling requirement
_MAX_ROWS_BLOCK = 2048 # ~1 MiB f32 noise tile per buffer; well under VMEM limits


def _cdiv(a, b):
    return -(-a // b)


def _dynamic_gnoise_kernel(x_ref, n_ref, o_ref, *, scaled_std):
    """One lane-dense tile:  out_u8 = clip(round(x_u8 + (255*std) * N(0,1)))."""
    x = x_ref[...].astype(jnp.float32)
    y = x + jnp.float32(scaled_std) * n_ref[...]
    # TODO(synk): torch's .byte() in to_pil_image wraps out-of-range values
    # modulo 256; we clip to keep the uint8 conversion well-defined.
    o_ref[...] = jnp.clip(jnp.round(y), 0.0, 255.0).astype(jnp.uint8)


def _noise_add_pallas(x2d_u8, noise2d_f32, std, rows_block):
    rows_total, lanes = x2d_u8.shape
    assert lanes == _LANE and rows_total % rows_block == 0
    kernel = functools.partial(_dynamic_gnoise_kernel,
                               scaled_std=255.0 * float(std))
    return pl.pallas_call(
        kernel,
        out_shape=jax.ShapeDtypeStruct((rows_total, _LANE), jnp.uint8),
        grid=(rows_total // rows_block,),
        in_specs=[
            pl.BlockSpec((rows_block, _LANE), lambda i: (i, 0)),  # uint8 image tile
            pl.BlockSpec((rows_block, _LANE), lambda i: (i, 0)),  # f32 noise tile
        ],
        out_specs=pl.BlockSpec((rows_block, _LANE), lambda i: (i, 0)),
        compiler_params=pltpu.CompilerParams(
            dimension_semantics=("parallel",),   # free on v5e/v6e, ~2x on v7x
            vmem_limit_bytes=64 * 1024 * 1024,
        ),
    )(x2d_u8, noise2d_f32)


class DynamicGNoise:
    """JAX/Pallas port of the PyTorch DynamicGNoise module."""

    def __init__(self, shape, std=0.0):
        self.shape = int(shape)
        self.std = float(std)
        # Mirrors torch.zeros(3, shape, shape); regenerated every training step.
        self.noise = jnp.zeros((3, self.shape, self.shape), dtype=jnp.float32)
        self.training = True

    def forward(self, img_hwc_u8, seed=0):
        if not self.training:
            # Eval path == torchvision to_tensor: HWC uint8 -> CHW f32 in [0,1].
            x_chw = jnp.transpose(img_hwc_u8.astype(jnp.float32), (2, 0, 1))
            return x_chw * jnp.float32(1.0 / 255.0)

        H, W, C = img_hwc_u8.shape
        n_elem = H * W * C

        # Lane-dense flattened layout, padded so every block is fully tiled
        # ((32,128) for uint8, (8,128) for f32).
        rows_needed = _cdiv(n_elem, _LANE)
        rows_block = min(_MAX_ROWS_BLOCK,
                         _cdiv(rows_needed, _SUBLANE_U8) * _SUBLANE_U8)
        rows_total = _cdiv(rows_needed, rows_block) * rows_block
        n_pad = rows_total * _LANE

        flat = jnp.ravel(img_hwc_u8)
        flat = jnp.pad(flat, (0, n_pad - n_elem))
        x2d = flat.reshape(rows_total, _LANE)

        # Noise is i.i.d. N(0,1), so drawing it directly in the flattened
        # layout is semantically equivalent to the (3,S,S) buffer.
        # TODO(synk): in-kernel pltpu.prng_seed/stateful_normal would avoid
        # streaming this buffer from HBM, but it has no interpret-mode
        # lowering; the buffer is materialized with jax.random instead
        # (matching PyTorch's explicit noise buffer).
        key = jax.random.PRNGKey(int(seed))
        noise2d = jax.random.normal(key, (rows_total, _LANE), dtype=jnp.float32)

        y2d = _noise_add_pallas(x2d, noise2d, self.std, rows_block)
        y = y2d.reshape(-1)[:n_elem].reshape(H, W, C)
        return y  # HWC uint8 "PIL image"

    __call__ = forward


if __name__ == "__main__":
    key = jax.random.PRNGKey(0)
    S = 16  # noise buffer (3, 16, 16); image 16x16x3

    img = jax.random.randint(key, (S, S, 3), 0, 256, dtype=jnp.int32).astype(jnp.uint8)

    # Training path: Gaussian noise added, uint8 HWC image out.
    mod = DynamicGNoise(shape=S, std=0.05)
    mod.training = True
    out_train = jax.block_until_ready(mod(img, seed=1234))
    assert out_train.shape == (S, S, 3) and out_train.dtype == jnp.uint8

    # std=0: folded scaling makes the round trip bit-exact.
    mod0 = DynamicGNoise(shape=S, std=0.0)
    mod0.training = True
    out_zero = jax.block_until_ready(mod0(img, seed=7))
    assert bool(jnp.all(out_zero == img)), "std=0 round-trip mismatch"

    # Eval path: to_tensor result (CHW float32 in [0,1]).
    mod.training = False
    out_eval = jax.block_until_ready(mod(img))
    assert out_eval.shape == (3, S, S) and out_eval.dtype == jnp.float32
    assert bool(jnp.all((out_eval >= 0.0) & (out_eval <= 1.0)))

    print("KERNEL_OK")
</pallas_src>

<mosaic_0001>
module attributes {stable_mosaic.version = 11 : i64} {
  func.func @_dynamic_gnoise_kernel(%arg0: i32, %arg1: memref<32x128xi8, #tpu.memory_space<vmem>>, %arg2: memref<32x128xf32, #tpu.memory_space<vmem>>, %arg3: memref<32x128xi8, #tpu.memory_space<vmem>>) attributes {dimension_semantics = [#tpu.dimension_semantics<parallel>], iteration_bounds = array<i64: 1>, scalar_prefetch = 0 : i64, scratch_operands = 0 : i64, tpu.core_type = #tpu.core_type<tc>, window_params = [{transform_indices = @transform_0, window_bounds = array<i64: 32, 128>}, {transform_indices = @transform_1, window_bounds = array<i64: 32, 128>}, {transform_indices = @transform_2, window_bounds = array<i64: 32, 128>}]} {
    %c0 = arith.constant 0 : index
    %c0_0 = arith.constant 0 : index
    %0 = vector.load %arg1[%c0, %c0_0] : memref<32x128xi8, #tpu.memory_space<vmem>>, vector<32x128xi8>
    %1 = arith.uitofp %0 : vector<32x128xi8> to vector<32x128xf32>
    %c0_1 = arith.constant 0 : index
    %c0_2 = arith.constant 0 : index
    %2 = vector.load %arg2[%c0_1, %c0_2] : memref<32x128xf32, #tpu.memory_space<vmem>>, vector<32x128xf32>
    %cst = arith.constant 1.275000e+01 : f32
    %3 = vector.broadcast %cst : f32 to vector<32x128xf32>
    %4 = arith.mulf %3, %2 : vector<32x128xf32>
    %5 = arith.addf %1, %4 : vector<32x128xf32>
    %6 = math.roundeven %5 : vector<32x128xf32>
    %cst_3 = arith.constant 0.000000e+00 : f32
    %cst_4 = arith.constant 2.550000e+02 : f32
    %7 = vector.broadcast %cst_3 : f32 to vector<32x128xf32>
    %8 = arith.maximumf %7, %6 : vector<32x128xf32>
    %9 = vector.broadcast %cst_4 : f32 to vector<32x128xf32>
    %10 = arith.minimumf %9, %8 : vector<32x128xf32>
    %11 = arith.fptoui %10 : vector<32x128xf32> to vector<32x128xi8>
    %c0_5 = arith.constant 0 : index
    %c0_6 = arith.constant 0 : index
    %12 = vector.load %arg3[%c0_5, %c0_6] : memref<32x128xi8, #tpu.memory_space<vmem>>, vector<32x128xi8>
    tpu.vector_store %arg3[%c0_5, %c0_6], %11 {strides = array<i32>} : memref<32x128xi8, #tpu.memory_space<vmem>>, vector<32x128xi8>,
    return
  }
  func.func @transform_0(%arg0: i32) -> (i32, i32) {
    %c0_i32 = arith.constant 0 : i32
    %c0_i32_0 = arith.constant 0 : i32
    return %arg0, %c0_i32 : i32, i32
  }
  func.func @transform_1(%arg0: i32) -> (i32, i32) {
    %c0_i32 = arith.constant 0 : i32
    %c0_i32_0 = arith.constant 0 : i32
    return %arg0, %c0_i32 : i32, i32
  }
  func.func @transform_2(%arg0: i32) -> (i32, i32) {
    %c0_i32 = arith.constant 0 : i32
    %c0_i32_0 = arith.constant 0 : i32
    return %arg0, %c0_i32 : i32, i32
  }
}

</mosaic_0001>

<bundles_post_ra>
// kernel: tpu_custom_call.1
= control target key start
LH: loop header
LB: loop body
LE: loop exit
PB: predicated region body
PF: predicated region fallthrough
CT: control target
= control target key end

     0   :  { %7 = vsyncpa [#allocation3], 0  ;;  %s250_s0 = inlined_call_operand.hbm [shape: u8[32,128], index: 0, kind: input, shape index: {}]   ;;  %s251_s1 = inlined_call_operand.hbm [shape: f32[32,128], index: 1, kind: input, shape index: {}]   ;;  %s252_s2 = inlined_call_operand.hbm [shape: u8[32,128], index: 2, kind: output, shape index: {}]  }
   0x1   :  { %8 = vsyncpa [#allocation6], 0 }
   0x2   :  { %9 = vsyncpa [#allocation4], 0  ;;  %s187_s9 = smov [#allocation2]   ;;  %s188_s11 = smov [#allocation5]  }
   0x3   :  { %s16_s10 = sshll.u32 %s187_s9, 4  ;;  %s25_s12 = sshll.u32 %s188_s11, 4  ;;  %s17_s10 = int_to_ptr.vmem [resolvable:$true] %s16_s10  ;;  %s207_s12 = int_to_ptr.vmem [resolvable:$true] %s25_s12 }
   0x4   :  { %s115_s15 = scalar_lea.hbm %s250_s0, 128 }
   0x5   :  { %p116_p0 = scmp.ne.s32.totalorder %s250_s0, %s115_s15  ;;  %p119_p1 = scmp.lt.u32.totalorder %s115_s15, %s250_s0 }
   0x7   :  { %p121_p2 = pnand %p119_p1, %p116_p0 }
   0x9   :  { %124 = shalt.err (!%p121_p2)
}
   0xa   :  { %s125_s20 = scalar_lea.vmem %s17_s10, 128  ;;  %p130_p4 = scmp.lt.s32.totalorder %s17_s10, %s17_s10 }
   0xb   :  { %p126_p3 = scmp.ne.s32.totalorder %s17_s10, %s125_s20  ;;  %p131_p5 = scmp.lt.s32.totalorder %s125_s20, %s125_s20 }
   0xd   :  { %p132_p6 = por %p131_p5, %p130_p4 }
   0xf   :  { %p133_p7 = pnand %p132_p6, %p126_p3 }
  0x11   :  { %136 = shalt.err (!%p133_p7)
}
  0x12   :  { %19 = dma.hbm_to_vmem [thread:$0]  %s250_s0, 128, %s17_s10, [#allocation3]  }
  0x13   :  { %s137_s25 = scalar_lea.hbm %s251_s1, 512 }
  0x14   :  { %p138_p8 = scmp.ne.s32.totalorder %s251_s1, %s137_s25  ;;  %p141_p9 = scmp.lt.u32.totalorder %s137_s25, %s251_s1 }
  0x16   :  { %p143_p10 = pnand %p141_p9, %p138_p8 }
  0x18   :  { %146 = shalt.err (!%p143_p10)
}
  0x19   :  { %s147_s30 = scalar_lea.vmem %s207_s12, 512  ;;  %p152_p12 = scmp.lt.s32.totalorder %s207_s12, %s207_s12 }
  0x1a   :  { %p148_p11 = scmp.ne.s32.totalorder %s207_s12, %s147_s30  ;;  %p153_p13 = scmp.lt.s32.totalorder %s147_s30, %s147_s30 }
  0x1c   :  { %p154_p0 = por %p153_p13, %p152_p12 }
  0x1e   :  { %p155_p1 = pnand %p154_p0, %p148_p11 }
  0x20   :  { %158 = shalt.err (!%p155_p1)
}
  0x21   :  { %s189_s0 = smov 128   ;;  %s190_s3 = smov 8  }
  0x22   :  { %31 = dma.hbm_to_vmem [thread:$0]  %s251_s1, 512, %s207_s12, [#allocation6], %s189_s0, %s189_s0, %s190_s3  }
  0x23   :  { %181 = dma.done.wait [#allocation3], 128  }
  0x24   :  { %182 = vsyncadd [#allocation3], 4294967168 }
  0x25   :  { %183 = dma.done.wait [#allocation6], 512  }
  0x26   :  { %184 = vsyncadd [#allocation6], 4294966784  ;;  %v38_v0 = vld [vmem:[#allocation2] sm:$0xff]  ;;  %v51_v1 = vld [vmem:[#allocation5] sm:$0xff]  ;;  %s191_s1 = smov [#allocation7]  }
  0x27   :  { %v52_v2 = vld [vmem:[#allocation5 + $0x8] sm:$0xff]  ;;  %v39_v3 = vunpack.c.0.s8 %v38_v0  ;;  %v40_v4 = vunpack.c.1.s8 %v38_v0  ;;  %v41_v5 = vunpack.c.2.s8 %v38_v0  ;;  %v42_v6 = vunpack.c.3.s8 %v38_v0  ;;  %v53_v7 = vld [vmem:[#allocation5 + $0x10] sm:$0xff]  ;;  %v54_v8 = vld [vmem:[#allocation5 + $0x18] sm:$0xff]  ;;  %s96_s6 = sshll.u32 %s191_s1, 4  ;;  %s97_s6 = int_to_ptr.vmem [resolvable:$true] %s96_s6 }
  0x28   :  { %v55_v9 = vmul.f32 12.75, %v51_v1  ;;  %v56_v10 = vmul.f32 12.75, %v52_v2  ;;  %v57_v11 = vmul.f32 12.75, %v53_v7  ;;  %v58_v12 = vmul.f32 12.75, %v54_v8  ;;  %s159_s7 = scalar_lea.vmem %s97_s6, 128  ;;  %p164_p3 = scmp.lt.s32.totalorder %s97_s6, %s97_s6 }
  0x29   :  { %v43_v13 = vand.u32 255, %v39_v3  ;;  %v44_v14 = vand.u32 255, %v40_v4  ;;  %v45_v15 = vand.u32 255, %v41_v5  ;;  %v46_v16 = vand.u32 255, %v42_v6  ;;  %p160_p2 = scmp.ne.s32.totalorder %s97_s6, %s159_s7  ;;  %p165_p4 = scmp.lt.s32.totalorder %s159_s7, %s159_s7 }
  0x2b   :  { %v47_v17 = vcvt.s32.f32 %v43_v13  ;;  %v48_v18 = vcvt.s32.f32 %v44_v14  ;;  %v49_v19 = vcvt.s32.f32 %v45_v15  ;;  %v50_v20 = vcvt.s32.f32 %v46_v16  ;;  %p166_p5 = por %p165_p4, %p164_p3 }
  0x2d   :  { %v59_v21 = vadd.f32 %v55_v9, %v47_v17  ;;  %v60_v22 = vadd.f32 %v56_v10, %v48_v18  ;;  %v61_v23 = vadd.f32 %v57_v11, %v49_v19  ;;  %v62_v24 = vadd.f32 %v58_v12, %v50_v20  ;;  %p167_p6 = pnand %p166_p5, %p160_p2 }
  0x2f   :  { %v106_v25 = vround.rtne.f32 %v59_v21  ;;  %v107_v26 = vround.rtne.f32 %v60_v22  ;;  %v108_v27 = vround.rtne.f32 %v61_v23  ;;  %v109_v28 = vround.rtne.f32 %v62_v24 }
  0x31   :  { %v67_v29 = vmax.f32 %v106_v25, 0.0  ;;  %v68_v30 = vmax.f32 %v107_v26, 0.0  ;;  %v69_v31 = vmax.f32 %v108_v27, 0.0  ;;  %v70_v32 = vmax.f32 %v109_v28, 0.0 }
  0x33   :  { %v71_v33 = vmin.f32 %v67_v29, 255.0  ;;  %v72_v34 = vmin.f32 %v68_v30, 255.0  ;;  %v73_v35 = vmin.f32 %v69_v31, 255.0  ;;  %v74_v36 = vmin.f32 %v70_v32, 255.0 }
  0x35   :  { %v75_v37 = vtrunc.f32 %v71_v33  ;;  %v76_v38 = vtrunc.f32 %v72_v34  ;;  %v77_v39 = vtrunc.f32 %v73_v35  ;;  %v78_v40 = vtrunc.f32 %v74_v36 }
  0x37   :  { %v79_v41 = vpack.c.f32.eXmY %v75_v37, %v76_v38, 56  ;;  %v83_v42 = vpack.c.f32.eXmY %v77_v39, %v78_v40, 56 }
  0x39   :  { %v87_v43 = vpack.c.b8 %v83_v42, %v79_v41 }
  0x3b   :  { %89 = vst [vmem:[#allocation7] sm:$0xff] %v87_v43 }
  0x3c   :  { %170 = shalt.err (!%p167_p6)
}
  0x3d   :  { %s171_s10 = scalar_lea.hbm %s252_s2, 128 }
  0x3e   :  { %p172_p7 = scmp.ne.s32.totalorder %s252_s2, %s171_s10  ;;  %p175_p8 = scmp.lt.u32.totalorder %s171_s10, %s252_s2 }
  0x40   :  { %p177_p9 = pnand %p175_p8, %p172_p7 }
  0x42   :  { %180 = shalt.err (!%p177_p9)
}
  0x43   :  { %99 = dma.vmem_to_hbm [thread:$0]  %s97_s6, 128, %s252_s2, [#allocation4]  }
  0x44   :  { %185 = dma.done.wait [#allocation4], 128  }
  0x45   :  { %186 = vsyncadd [#allocation4], 4294967168 }
  0x46   :  { %103 = vsyncpa [#allocation3], 1 }
  0x47   :  { %104 = vsyncpa [#allocation6], 1 }
  0x48   :  { %105 = vsyncpa [#allocation4], 1 }

</bundles_post_ra>
